<compile_context>
chip_gen: v7x
topology: tpu7x:2x2x1
jax: 0.10.0
libtpu: 0.0.40
codegen_flags: <defaults>
</compile_context>

<pallas_src>
import jax
import jax.numpy as jnp
from jax.experimental import pallas as pl
from jax.experimental.pallas import tpu as pltpu

# Config (config.dim, config.heads, config.dim_head) — small synthetic sizes.
DIM = 32
HEADS = 4
DIM_HEAD = 8
INNER = HEADS * DIM_HEAD          # 32
SCALE = DIM_HEAD ** (-0.5)
# project_out == True since not (heads == 1 and dim_head == dim)

# TODO(synk): nn.Dropout(config.dropout) inside to_out is a no-op at inference; not modeled.


def attention_kernel(x_ref, wq_ref, wk_ref, wv_ref, wo_ref, bo_ref, o_ref):
    Bt, N, D = x_ref.shape
    H, _, Dh = wq_ref.shape
    T = Bt * N
    cdt = wq_ref.dtype                       # matmul-operand dtype (f32 or bf16)

    # (Bt, N, D) -> (T, D): leading-dim collapse, minor dim unchanged (free).
    x = x_ref[...].reshape(T, D).astype(cdt)
    xh = jnp.broadcast_to(x, (H, T, D))      # head-batched view of the token slab

    # qkv projection (to_qkv, no bias), head-batched so q/k/v come out already
    # head-major [H, T, Dh] with no in-kernel slicing / transposes.  The MXU
    # accumulates in f32 regardless of operand dtype.
    q = jnp.einsum('htd,hdk->htk', xh, wq_ref[...],
                   preferred_element_type=jnp.float32).astype(cdt)
    k = jnp.einsum('htd,hdk->htk', xh, wk_ref[...],
                   preferred_element_type=jnp.float32).astype(cdt)
    v = jnp.einsum('htd,hdk->htk', xh, wv_ref[...],
                   preferred_element_type=jnp.float32).astype(cdt)

    # Fold the batch tile into the attention batch dim: [H, T, Dh] -> [H*Bt, N, Dh]
    # so attention never mixes tokens from different batch elements.
    def fold_heads_batch(t):
        if Bt == 1:
            return t                          # already [H, N, Dh]
        return t.reshape(H, Bt, N, Dh).reshape(H * Bt, N, Dh)

    q, k, v = fold_heads_batch(q), fold_heads_batch(k), fold_heads_batch(v)

    # Scores + numerically stable softmax — all f32 on the VPU/EUP (v5e friendly).
    # TODO(synk): at real ViT sizes (N in the hundreds) switch to a kv-tiled
    # online softmax so the [H, N, N] scores are never fully materialized
    # (matters for v7x's 64 MiB VMEM); at N=8 they are tiny.
    s = jnp.einsum('bqd,bkd->bqk', q, k,
                   preferred_element_type=jnp.float32) * SCALE      # [H*Bt, N, N]
    m = jnp.max(s, axis=-1, keepdims=True)
    p = jnp.exp(s - m)
    denom = jnp.sum(p, axis=-1, keepdims=True)
    attn = p * pl.reciprocal(denom, approx=True)                    # EUP vrcp

    out = jnp.einsum('bqk,bkd->bqd', attn.astype(cdt), v,
                     preferred_element_type=jnp.float32)            # [H*Bt, N, Dh]

    # Fused 'b h n d -> b n (h d)' merge + to_out Linear: contract each head's
    # output with its [Dh, D] slice of W_out and reduce over heads (no concat).
    if Bt == 1:
        out_h = out.astype(cdt)                                     # [H, T, Dh]
    else:
        out_h = out.reshape(H, Bt, N, Dh).reshape(H, T, Dh).astype(cdt)
    y = jnp.einsum('htd,hdo->hto', out_h, wo_ref[...],
                   preferred_element_type=jnp.float32)              # [H, T, D]
    y = jnp.sum(y, axis=0) + bo_ref[...].astype(jnp.float32)        # [T, D]

    o_ref[...] = y.astype(o_ref.dtype)


def attention(x, w_qkv, w_out, b_out, *, compute_dtype=jnp.float32, batch_tile=None):
    B, N, D = x.shape
    assert D == DIM and w_qkv.shape == (DIM, 3 * INNER)
    out_dtype = x.dtype

    if batch_tile is None:
        # Fold the batch into as few grid steps as possible while keeping >= 2
        # steps, so v7x's two TensorCores each get a "parallel" slice of the grid.
        batch_tile = B // 2 if (B >= 2 and B % 2 == 0) else 1
    assert B % batch_tile == 0
    grid = (B // batch_tile,)

    # Wrapper-side layout plumbing (free): split the fused qkv weight and the
    # output weight per head so the kernel needs no slicing or transposes.
    w_qkv_r = w_qkv.reshape(D, 3, HEADS, DIM_HEAD)
    wq = jnp.transpose(w_qkv_r[:, 0], (1, 0, 2)).astype(compute_dtype)   # [H, D, Dh]
    wk = jnp.transpose(w_qkv_r[:, 1], (1, 0, 2)).astype(compute_dtype)
    wv = jnp.transpose(w_qkv_r[:, 2], (1, 0, 2)).astype(compute_dtype)
    wo = w_out.reshape(HEADS, DIM_HEAD, D).astype(compute_dtype)         # [H, Dh, D]
    x_c = x.astype(compute_dtype)

    out2d = pl.pallas_call(
        attention_kernel,
        out_shape=jax.ShapeDtypeStruct((B * N, D), out_dtype),
        grid_spec=pltpu.PrefetchScalarGridSpec(
            num_scalar_prefetch=0,
            grid=grid,
            in_specs=[
                # per-step batch tile of tokens
                pl.BlockSpec((batch_tile, N, D), lambda i: (i, 0, 0)),
                # weights/bias: constant index_map => DMA'd once, VMEM-resident
                pl.BlockSpec((HEADS, D, DIM_HEAD), lambda i: (0, 0, 0)),
                pl.BlockSpec((HEADS, D, DIM_HEAD), lambda i: (0, 0, 0)),
                pl.BlockSpec((HEADS, D, DIM_HEAD), lambda i: (0, 0, 0)),
                pl.BlockSpec((HEADS, DIM_HEAD, D), lambda i: (0, 0, 0)),
                pl.BlockSpec((1, D), lambda i: (0, 0)),
            ],
            # 2-D, sublane-aligned output block (Bt*N rows of D lanes).
            out_specs=pl.BlockSpec((batch_tile * N, D), lambda i: (i, 0)),
        ),
        compiler_params=pltpu.CompilerParams(
            dimension_semantics=("parallel",)),
    )(x_c, wq, wk, wv, wo, b_out)

    return out2d.reshape(B, N, D)


def attention_ref(x, w_qkv, w_out, b_out):
    """Pure-JAX reference mirroring the PyTorch forward."""
    B, N, D = x.shape
    qkv = x @ w_qkv                                   # [B, N, 3*INNER]
    q, k, v = jnp.split(qkv, 3, axis=-1)

    def to_heads(t):
        return t.reshape(B, N, HEADS, DIM_HEAD).transpose(0, 2, 1, 3)   # [B, H, N, Dh]

    q, k, v = map(to_heads, (q, k, v))
    dots = jnp.einsum('bhnd,bhmd->bhnm', q, k) * SCALE
    attn = jax.nn.softmax(dots, axis=-1)
    out = jnp.einsum('bhnm,bhmd->bhnd', attn, v)
    out = out.transpose(0, 2, 1, 3).reshape(B, N, INNER)
    return out @ w_out + b_out[0]


if __name__ == "__main__":
    key = jax.random.PRNGKey(0)
    k_x, k_qkv, k_wo, k_bo = jax.random.split(key, 4)

    B, N = 2, 8
    x = jax.random.normal(k_x, (B, N, DIM), dtype=jnp.float32)

    # Parameters stored as [in_features, out_features] so the kernel does x @ W.
    w_qkv = jax.random.normal(k_qkv, (DIM, 3 * INNER), dtype=jnp.float32) * (DIM ** -0.5)
    w_out = jax.random.normal(k_wo, (INNER, DIM), dtype=jnp.float32) * (INNER ** -0.5)
    b_out = jax.random.normal(k_bo, (1, DIM), dtype=jnp.float32) * 0.02

    y_ref = attention_ref(x, w_qkv, w_out, b_out)

    # f32 MXU operands (exact path; also the right choice on v5e).
    y_f32 = jax.block_until_ready(attention(x, w_qkv, w_out, b_out))
    assert y_f32.shape == (B, N, DIM)
    assert jnp.allclose(y_f32, y_ref, atol=5e-3, rtol=5e-3), "f32 path mismatch vs reference"

    # bf16 MXU operands, f32 accumulation + f32 softmax (preferred on v6e/v7x).
    y_bf16 = jax.block_until_ready(
        attention(x, w_qkv, w_out, b_out, compute_dtype=jnp.bfloat16))
    assert y_bf16.shape == (B, N, DIM)
    assert jnp.allclose(y_bf16, y_ref, atol=5e-2, rtol=5e-2), "bf16 path mismatch vs reference"

    print("KERNEL_OK")
</pallas_src>

<mosaic_0001>
module attributes {stable_mosaic.version = 11 : i64} {
  func.func @attention_kernel(%arg0: i32, %arg1: memref<1x8x32xf32, #tpu.memory_space<vmem>>, %arg2: memref<4x32x8xf32, #tpu.memory_space<vmem>>, %arg3: memref<4x32x8xf32, #tpu.memory_space<vmem>>, %arg4: memref<4x32x8xf32, #tpu.memory_space<vmem>>, %arg5: memref<4x8x32xf32, #tpu.memory_space<vmem>>, %arg6: memref<1x32xf32, #tpu.memory_space<vmem>>, %arg7: memref<8x32xf32, #tpu.memory_space<vmem>>) attributes {dimension_semantics = [#tpu.dimension_semantics<parallel>], iteration_bounds = array<i64: 2>, scalar_prefetch = 0 : i64, scratch_operands = 0 : i64, tpu.core_type = #tpu.core_type<tc>, window_params = [{transform_indices = @transform_0, window_bounds = array<i64: 1, 8, 32>}, {pipeline_mode = #tpu.pipeline_mode<synchronous>, transform_indices = @transform_1, window_bounds = array<i64: 4, 32, 8>}, {pipeline_mode = #tpu.pipeline_mode<synchronous>, transform_indices = @transform_2, window_bounds = array<i64: 4, 32, 8>}, {pipeline_mode = #tpu.pipeline_mode<synchronous>, transform_indices = @transform_3, window_bounds = array<i64: 4, 32, 8>}, {pipeline_mode = #tpu.pipeline_mode<synchronous>, transform_indices = @transform_4, window_bounds = array<i64: 4, 8, 32>}, {pipeline_mode = #tpu.pipeline_mode<synchronous>, transform_indices = @transform_5, window_bounds = array<i64: 1, 32>}, {transform_indices = @transform_6, window_bounds = array<i64: 8, 32>}]} {
    %c0 = arith.constant 0 : index
    %c0_0 = arith.constant 0 : index
    %c0_1 = arith.constant 0 : index
    %0 = vector.load %arg1[%c0, %c0_0, %c0_1] : memref<1x8x32xf32, #tpu.memory_space<vmem>>, vector<1x8x32xf32>
    %1 = vector.shape_cast %0 : vector<1x8x32xf32> to vector<8x32xf32>
    %2 = vector.shape_cast %1 : vector<8x32xf32> to vector<1x8x32xf32>
    %3 = vector.broadcast %2 : vector<1x8x32xf32> to vector<4x8x32xf32>
    %c0_2 = arith.constant 0 : index
    %c0_3 = arith.constant 0 : index
    %c0_4 = arith.constant 0 : index
    %4 = vector.load %arg2[%c0_2, %c0_3, %c0_4] : memref<4x32x8xf32, #tpu.memory_space<vmem>>, vector<4x32x8xf32>
    "tpu.trace_start"() <{level = 10 : i32, message = "htd,hdk->htk"}> : () -> ()
    %cst = arith.constant dense<0.000000e+00> : vector<4x8x8xf32>
    %5 = tpu.matmul %3, %4, %cst {dimension_numbers = #tpu.dot_dimension_numbers<[2], [1], [1], [2], [0, 0, 0, 1, 1, 2], [0], [0]>} : vector<4x8x32xf32>, vector<4x32x8xf32>, vector<4x8x8xf32> -> vector<4x8x8xf32>
    "tpu.trace_stop"() : () -> ()
    %c0_5 = arith.constant 0 : index
    %c0_6 = arith.constant 0 : index
    %c0_7 = arith.constant 0 : index
    %6 = vector.load %arg3[%c0_5, %c0_6, %c0_7] : memref<4x32x8xf32, #tpu.memory_space<vmem>>, vector<4x32x8xf32>
    "tpu.trace_start"() <{level = 10 : i32, message = "htd,hdk->htk"}> : () -> ()
    %cst_8 = arith.constant dense<0.000000e+00> : vector<4x8x8xf32>
    %7 = tpu.matmul %3, %6, %cst_8 {dimension_numbers = #tpu.dot_dimension_numbers<[2], [1], [1], [2], [0, 0, 0, 1, 1, 2], [0], [0]>} : vector<4x8x32xf32>, vector<4x32x8xf32>, vector<4x8x8xf32> -> vector<4x8x8xf32>
    "tpu.trace_stop"() : () -> ()
    %c0_9 = arith.constant 0 : index
    %c0_10 = arith.constant 0 : index
    %c0_11 = arith.constant 0 : index
    %8 = vector.load %arg4[%c0_9, %c0_10, %c0_11] : memref<4x32x8xf32, #tpu.memory_space<vmem>>, vector<4x32x8xf32>
    "tpu.trace_start"() <{level = 10 : i32, message = "htd,hdk->htk"}> : () -> ()
    %cst_12 = arith.constant dense<0.000000e+00> : vector<4x8x8xf32>
    %9 = tpu.matmul %3, %8, %cst_12 {dimension_numbers = #tpu.dot_dimension_numbers<[2], [1], [1], [2], [0, 0, 0, 1, 1, 2], [0], [0]>} : vector<4x8x32xf32>, vector<4x32x8xf32>, vector<4x8x8xf32> -> vector<4x8x8xf32>
    "tpu.trace_stop"() : () -> ()
    "tpu.trace_start"() <{level = 10 : i32, message = "bqd,bkd->bqk"}> : () -> ()
    %cst_13 = arith.constant dense<0.000000e+00> : vector<4x8x8xf32>
    %10 = tpu.matmul %5, %7, %cst_13 {dimension_numbers = #tpu.dot_dimension_numbers<[2], [2], [1], [1], [0, 0, 0, 1, 1, 1], [0], [0]>} : vector<4x8x8xf32>, vector<4x8x8xf32>, vector<4x8x8xf32> -> vector<4x8x8xf32>
    "tpu.trace_stop"() : () -> ()
    %cst_14 = arith.constant 0.353553385 : f32
    %11 = vector.broadcast %cst_14 : f32 to vector<4x8x8xf32>
    %12 = arith.mulf %10, %11 : vector<4x8x8xf32>
    %cst_15 = arith.constant dense<0xFF800000> : vector<4x8xf32>
    %13 = vector.multi_reduction <maximumf>, %12, %cst_15 [2] : vector<4x8x8xf32> to vector<4x8xf32>
    %14 = vector.shape_cast %13 : vector<4x8xf32> to vector<4x8x1xf32>
    %15 = vector.broadcast %14 : vector<4x8x1xf32> to vector<4x8x8xf32>
    %16 = arith.subf %12, %15 : vector<4x8x8xf32>
    %17 = math.exp %16 : vector<4x8x8xf32>
    %cst_16 = arith.constant dense<0.000000e+00> : vector<4x8xf32>
    %18 = vector.multi_reduction <add>, %17, %cst_16 [2] : vector<4x8x8xf32> to vector<4x8xf32>
    %19 = vector.shape_cast %18 : vector<4x8xf32> to vector<4x8x1xf32>
    %20 = tpu.reciprocal %19 {approx = true} : vector<4x8x1xf32> -> vector<4x8x1xf32>
    %21 = vector.broadcast %20 : vector<4x8x1xf32> to vector<4x8x8xf32>
    %22 = arith.mulf %17, %21 : vector<4x8x8xf32>
    "tpu.trace_start"() <{level = 10 : i32, message = "bqk,bkd->bqd"}> : () -> ()
    %cst_17 = arith.constant dense<0.000000e+00> : vector<4x8x8xf32>
    %23 = tpu.matmul %22, %9, %cst_17 {dimension_numbers = #tpu.dot_dimension_numbers<[2], [1], [1], [2], [0, 0, 0, 1, 1, 2], [0], [0]>} : vector<4x8x8xf32>, vector<4x8x8xf32>, vector<4x8x8xf32> -> vector<4x8x8xf32>
    "tpu.trace_stop"() : () -> ()
    %c0_18 = arith.constant 0 : index
    %c0_19 = arith.constant 0 : index
    %c0_20 = arith.constant 0 : index
    %24 = vector.load %arg5[%c0_18, %c0_19, %c0_20] : memref<4x8x32xf32, #tpu.memory_space<vmem>>, vector<4x8x32xf32>
    "tpu.trace_start"() <{level = 10 : i32, message = "htd,hdo->hto"}> : () -> ()
    %cst_21 = arith.constant dense<0.000000e+00> : vector<4x8x32xf32>
    %25 = tpu.matmul %23, %24, %cst_21 {dimension_numbers = #tpu.dot_dimension_numbers<[2], [1], [1], [2], [0, 0, 0, 1, 1, 2], [0], [0]>} : vector<4x8x8xf32>, vector<4x8x32xf32>, vector<4x8x32xf32> -> vector<4x8x32xf32>
    "tpu.trace_stop"() : () -> ()
    %cst_22 = arith.constant dense<0.000000e+00> : vector<8x32xf32>
    %26 = vector.multi_reduction <add>, %25, %cst_22 [0] : vector<4x8x32xf32> to vector<8x32xf32>
    %c0_23 = arith.constant 0 : index
    %c0_24 = arith.constant 0 : index
    %27 = vector.load %arg6[%c0_23, %c0_24] : memref<1x32xf32, #tpu.memory_space<vmem>>, vector<1x32xf32>
    %28 = vector.broadcast %27 : vector<1x32xf32> to vector<8x32xf32>
    %29 = arith.addf %26, %28 : vector<8x32xf32>
    %c0_25 = arith.constant 0 : index
    %c0_26 = arith.constant 0 : index
    %30 = vector.load %arg7[%c0_25, %c0_26] : memref<8x32xf32, #tpu.memory_space<vmem>>, vector<8x32xf32>
    tpu.vector_store %arg7[%c0_25, %c0_26], %29 {strides = array<i32>} : memref<8x32xf32, #tpu.memory_space<vmem>>, vector<8x32xf32>,
    return
  }
  func.func @transform_0(%arg0: i32) -> (i32, i32, i32) {
    %c0_i32 = arith.constant 0 : i32
    %c0_i32_0 = arith.constant 0 : i32
    %c0_i32_1 = arith.constant 0 : i32
    return %arg0, %c0_i32, %c0_i32_0 : i32, i32, i32
  }
  func.func @transform_1(%arg0: i32) -> (i32, i32, i32) {
    %c0_i32 = arith.constant 0 : i32
    %c0_i32_0 = arith.constant 0 : i32
    %c0_i32_1 = arith.constant 0 : i32
    %c0_i32_2 = arith.constant 0 : i32
    return %c0_i32, %c0_i32_0, %c0_i32_1 : i32, i32, i32
  }
  func.func @transform_2(%arg0: i32) -> (i32, i32, i32) {
    %c0_i32 = arith.constant 0 : i32
    %c0_i32_0 = arith.constant 0 : i32
    %c0_i32_1 = arith.constant 0 : i32
    %c0_i32_2 = arith.constant 0 : i32
    return %c0_i32, %c0_i32_0, %c0_i32_1 : i32, i32, i32
  }
  func.func @transform_3(%arg0: i32) -> (i32, i32, i32) {
    %c0_i32 = arith.constant 0 : i32
    %c0_i32_0 = arith.constant 0 : i32
    %c0_i32_1 = arith.constant 0 : i32
    %c0_i32_2 = arith.constant 0 : i32
    return %c0_i32, %c0_i32_0, %c0_i32_1 : i32, i32, i32
  }
  func.func @transform_4(%arg0: i32) -> (i32, i32, i32) {
    %c0_i32 = arith.constant 0 : i32
    %c0_i32_0 = arith.constant 0 : i32
    %c0_i32_1 = arith.constant 0 : i32
    %c0_i32_2 = arith.constant 0 : i32
    return %c0_i32, %c0_i32_0, %c0_i32_1 : i32, i32, i32
  }
  func.func @transform_5(%arg0: i32) -> (i32, i32) {
    %c0_i32 = arith.constant 0 : i32
    %c0_i32_0 = arith.constant 0 : i32
    %c0_i32_1 = arith.constant 0 : i32
    return %c0_i32, %c0_i32_0 : i32, i32
  }
  func.func @transform_6(%arg0: i32) -> (i32, i32) {
    %c0_i32 = arith.constant 0 : i32
    %c0_i32_0 = arith.constant 0 : i32
    return %arg0, %c0_i32 : i32, i32
  }
}

</mosaic_0001>

<bundles_post_ra>
// kernel: tpu_custom_call.1
= control target key start
LH: loop header
LB: loop body
LE: loop exit
PB: predicated region body
PF: predicated region fallthrough
CT: control target
= control target key end

     0   :  { %11 = vsyncpa [#allocation3], 0  ;;  %s3122_s0 = inlined_call_operand.vmem [shape: f32[2,8,32], index: 0, kind: input, shape index: {}]   ;;  %s3123_s1 = inlined_call_operand.vmem [shape: f32[4,32,8], index: 1, kind: input, shape index: {}]   ;;  %s3124_s2 = inlined_call_operand.vmem [shape: f32[4,32,8], index: 2, kind: input, shape index: {}]   ;;  %s3125_s3 = inlined_call_operand.vmem [shape: f32[4,32,8], index: 3, kind: input, shape index: {}]   ;;  %s3126_s4 = inlined_call_operand.vmem [shape: f32[4,8,32], index: 4, kind: input, shape index: {}]   ;;  %s3127_s5 = inlined_call_operand.vmem [shape: f32[1,32], index: 5, kind: input, shape index: {}]   ;;  %s3128_s6 = inlined_call_operand.hbm [shape: f32[16,32], index: 6, kind: output, shape index: {}]  }
   0x1   :  { %13 = vsyncpa [#allocation3 + $0x1], 0  ;;  %s2718_s21 = smov 0   ;;  %s2720_s22 = smov 0  }
   0x2   :  { %s2722_s23 = smov 0   ;;  %s2724_s24 = smov 0  }
   0x3 LB: > { %s2739_s25 = sadd.s32 4294967295, %s2677_s24   ;;  %s2170_s26 = sadd.s32 4294967294, %s2677_s24   ;;  %s2677_s24 = sphi %s2724_s24, %s3134_s24   ;;  %s2673_s23 = sphi %s2722_s23, %s3133_s23   ;;  %s2669_s22 = sphi %s2720_s22, %s3132_s22   ;;  %s2665_s21 = sphi %s2718_s21, %s3131_s21  }
   0x4   : > { %s2743_s27 = sadd.s32 1, %s2677_s24   ;;  %s157_s28 = sadd.s32 1, %s2673_s23 }
   0x5   : > { %s154_s29 = ssub.s32 %s2677_s24, %s2743_s27  ;;  %p167_p0 = scmp.ne.s32.totalorder %s2673_s23, %s2669_s22 }
   0x6   : > { %p155_p1 = scmp.eq.s32.totalorder %s154_s29, 0  ;;  %p168_p2 = scmp.eq.s32.totalorder %s2739_s25, 1 }
   0x7   : > { %p173_p3 = scmp.ne.s32.totalorder %s2669_s22, %s2665_s21  ;;  %p174_p4 = scmp.eq.s32.totalorder %s2170_s26, 1 }
   0x8   : > { %s2754_s30 = scalar_select %p155_p1, %s2673_s23, %s157_s28  }
   0x9   : > { %p2756_p5 = por %p168_p2, %p167_p0  ;;  %p2760_p6 = por %p174_p4, %p173_p3 }
   0xa   : > { %p2173_p7 = scmp.ge.s32.totalorder %s2677_s24, 1  ;;  %p214_p8 = scmp.lt.s32.totalorder %s2677_s24, 3 }
   0xc   : > { %p215_p9 = pnand %p2173_p7, %p214_p8 }
   0xd   : > { %v248_v0 = vld [vmem:[%s3123_s1] sm:$0xff] (!%p215_p9)  ;;  %v249_v1 = vld [vmem:[%s3123_s1 + $0x8] sm:$0xff] (!%p215_p9)  ;;  %v2679_v3 = vmov (!%p215_p9), 0.0|0.0   ;;  %v250_v6 = vld [vmem:[%s3123_s1 + $0x10] sm:$0xff] (!%p215_p9)  ;;  %p243_p10 = scmp.lt.s32.totalorder (!%p215_p9), %s2739_s25, 1  ;;  %vm2680_vm0 = vmmov (!%p215_p9), 0  }
   0xe   : > { %218 = sbr.rel (%p215_p9) target bundleno = 1240 (0x4d8), region = 44  ;;  %v252_v2 = vld [vmem:[%s3123_s1 + $0x20] sm:$0xff] (!%p215_p9)  ;;  %2485 = vmatprep.subr.bf16.mxu0 (!%p215_p9), %v2679_v3  ;;  %2491 = vmatprep.subr.bf16.mxu1 (!%p215_p9), %v2679_v3  ;;  %v2486_v4 = vpack.c.bf16 (!%p215_p9), %v249_v1, %v248_v0  ;;  %v253_v5 = vld [vmem:[%s3123_s1 + $0x28] sm:$0xff] (!%p215_p9)  ;;  %v251_v7 = vld [vmem:[%s3123_s1 + $0x18] sm:$0xff] (!%p215_p9)  ;;  %v2681_v11 = vmov (!%p215_p9), 0.0   ;;  %vm264_vm1 = vcmask (!%p215_p9), 261120  }
   0xf   : > { %v2492_v8 = vpack.c.bf16 (!%p215_p9), %v253_v5, %v252_v2  ;;  %v254_v9 = vld [vmem:[%s3123_s1 + $0x30] sm:$0xff] (!%p215_p9)  ;;  %v255_v10 = vld [vmem:[%s3123_s1 + $0x38] sm:$0xff] (!%p215_p9)  ;;  %2301 = vmatprep.mubr.msk.f32.mxu0 (!%p215_p9), %vm2680_vm0, %v2681_v11  ;;  %2312 = vmatprep.mubr.msk.f32.mxu1 (!%p215_p9), %vm2680_vm0, %v2681_v11  ;;  %v2489_v12 = vpack.c.bf16 (!%p215_p9), %v251_v7, %v250_v6  ;;  %v256_v14 = vld [vmem:[%s3123_s1 + $0x40] sm:$0xff] (!%p215_p9)  ;;  %vm1140_vm2 = vcmask (!%p215_p9), 64512   ;;  %s240_s13 = sand.u32 (!%p215_p9), 1, %s2669_s22   ;;  %s2206_s17 = sshll.u32 (!%p215_p9), %s2739_s25, 7 }
  0x10   : > { %2487 = vmatpush3.bf16.msra.mxu0 (!%p215_p9), %v2486_v4  ;;  %v2495_v13 = vpack.c.bf16 (!%p215_p9), %v255_v10, %v254_v9  ;;  %v257_v15 = vld [vmem:[%s3123_s1 + $0x48] sm:$0xff] (!%p215_p9)  ;;  %v260_v16 = vld [vmem:[%s3123_s1 + $0x60] sm:$0xff] (!%p215_p9)  ;;  %v258_v21 = vld [vmem:[%s3123_s1 + $0x50] sm:$0xff] (!%p215_p9)  ;;  %s2174_s14 = sshll.u32 (!%p215_p9), %s240_s13, 3  ;;  %s2098_s29 = scalar_lea.sflag (!%p215_p9), [#allocation3], %s240_s13 }
  0x11   : > { %2493 = vmatpush3.bf16.msra.mxu1 (!%p215_p9), %v2492_v8  ;;  %2488 = vmatprep.subr.bf16.mxu0 (!%p215_p9), %v2679_v3  ;;  %v261_v17 = vld [vmem:[%s3123_s1 + $0x68] sm:$0xff] (!%p215_p9)  ;;  %v2498_v19 = vpack.c.bf16 (!%p215_p9), %v257_v15, %v256_v14  ;;  %v259_v22 = vld [vmem:[%s3123_s1 + $0x58] sm:$0xff] (!%p215_p9)  ;;  %v262_v23 = vld [vmem:[%s3123_s1 + $0x70] sm:$0xff] (!%p215_p9)  ;;  %s242_s18 = scalar_lea.vmem (!%p215_p9), [#allocation2], %s2174_s14 }
  0x12   : > { %2494 = vmatprep.subr.bf16.mxu1 (!%p215_p9), %v2679_v3  ;;  %v2504_v20 = vpack.c.bf16 (!%p215_p9), %v261_v17, %v260_v16  ;;  %v263_v24 = vld [vmem:[%s3123_s1 + $0x78] sm:$0xff] (!%p215_p9)  ;;  %v2501_v25 = vpack.c.bf16 (!%p215_p9), %v259_v22, %v258_v21  ;;  %v548_v27 = vld [vmem:[%s3124_s2] sm:$0xff] (!%p215_p9)  ;;  %v549_v28 = vld [vmem:[%s3124_s2 + $0x8] sm:$0xff] (!%p215_p9)  ;;  %s2111_s19 = sshll.u32 (!%p215_p9), %s242_s18, 4  ;;  %s3081_s19 = int_to_ptr.vmem [resolvable:$true] %s2111_s19 }
  0x13   : > { %v2507_v26 = vpack.c.bf16 (!%p215_p9), %v263_v24, %v262_v23  ;;  %v552_v29 = vld [vmem:[%s3124_s2 + $0x20] sm:$0xff] (!%p215_p9)  ;;  %v553_v30 = vld [vmem:[%s3124_s2 + $0x28] sm:$0xff] (!%p215_p9)  ;;  %v2510_v31 = vpack.c.bf16 (!%p215_p9), %v549_v28, %v548_v27  ;;  %v550_v33 = vld [vmem:[%s3124_s2 + $0x10] sm:$0xff] (!%p215_p9)  ;;  %s2615_s9 = scalar_lea.vmem (!%p215_p9), %s3081_s19, 128 }
  0x14   : > { %2490 = vmatpush3.bf16.msra.mxu0 (!%p215_p9), %v2489_v12  ;;  %v2516_v32 = vpack.c.bf16 (!%p215_p9), %v553_v30, %v552_v29  ;;  %v551_v34 = vld [vmem:[%s3124_s2 + $0x18] sm:$0xff] (!%p215_p9)  ;;  %v554_v35 = vld [vmem:[%s3124_s2 + $0x30] sm:$0xff] (!%p215_p9)  ;;  %v556_v39 = vld [vmem:[%s3124_s2 + $0x40] sm:$0xff] (!%p215_p9)  ;;  %p2616_p11 = scmp.ne.s32.totalorder (!%p215_p9), %s3081_s19, %s2615_s9 }
  0x15   : > { %s244_s10 = scalar_select %p243_p10, %s2739_s25, 1  ;;  %2496 = vmatpush3.bf16.msra.mxu1 %v2495_v13  ;;  %2497 = vmatprep.subr.bf16.mxu0 %v2679_v3  ;;  %v555_v36 = vld [vmem:[%s3124_s2 + $0x38] sm:$0xff]  ;;  %v2513_v37 = vpack.c.bf16 %v551_v34, %v550_v33  ;;  %v557_v40 = vld [vmem:[%s3124_s2 + $0x48] sm:$0xff]  ;;  %v560_v41 = vld [vmem:[%s3124_s2 + $0x60] sm:$0xff] }
  0x16   : > { %2503 = vmatprep.subr.bf16.mxu1 %v2679_v3  ;;  %v2519_v38 = vpack.c.bf16 %v555_v36, %v554_v35  ;;  %v561_v42 = vld [vmem:[%s3124_s2 + $0x68] sm:$0xff]  ;;  %v2522_v43 = vpack.c.bf16 %v557_v40, %v556_v39  ;;  %v558_v45 = vld [vmem:[%s3124_s2 + $0x50] sm:$0xff]  ;;  %v559_v46 = vld [vmem:[%s3124_s2 + $0x58] sm:$0xff]  ;;  %p2617_p12 = pnand %p2616_p11, %p2756_p5  ;;  %s2682_s25 = smov [#allocation2]  }
  0x17   : > { %s2175_s15 = sshll.u32 %s244_s10, 3  ;;  %v2528_v44 = vpack.c.bf16 %v561_v42, %v560_v41  ;;  %v562_v47 = vld [vmem:[%s3124_s2 + $0x70] sm:$0xff]  ;;  %v563_v48 = vld [vmem:[%s3124_s2 + $0x78] sm:$0xff]  ;;  %v2525_v49 = vpack.c.bf16 %v559_v46, %v558_v45  ;;  %v844_v51 = vld [vmem:[%s3125_s3] sm:$0xff]  ;;  %s2619_s10 = sshll.u32 %s2682_s25, 4  ;;  %s2620_s10 = int_to_ptr.vmem [resolvable:$false] %s2619_s10 }
  0x18   : > { %s246_s28 = scalar_lea.vmem %s3122_s0, %s2175_s15  ;;  %v2531_v50 = vpack.c.bf16 %v563_v48, %v562_v47  ;;  %v845_v52 = vld [vmem:[%s3125_s3 + $0x8] sm:$0xff]  ;;  %v848_v53 = vld [vmem:[%s3125_s3 + $0x20] sm:$0xff]  ;;  %v846_v57 = vld [vmem:[%s3125_s3 + $0x10] sm:$0xff]  ;;  %p2618_p13 = pneg %p2617_p12 }
  0x19   : > { %v2815_v18 = vld [vmem:[%s246_s28] sm:$0xff]  ;;  %v849_v54 = vld [vmem:[%s3125_s3 + $0x28] sm:$0xff]  ;;  %v2534_v55 = vpack.c.bf16 %v845_v52, %v844_v51  ;;  %v847_v58 = vld [vmem:[%s3125_s3 + $0x18] sm:$0xff]  ;;  %s3079_s28 = scalar_lea.hbm %s3128_s6, %s2206_s17  ;;  %s2621_s11 = scalar_lea.vmem %s2620_s10, 256 }
  0x1a   : > { %2302 = vmatmul.mubr.msk.f32.vlgmr.msra.gmra.mrb[0].mxu0 %vm264_vm1, %v2815_v18  ;;  %2313 = vmatmul.mubr.msk.f32.vlgmr.msra.gmra.mrb[0].mxu1 %vm264_vm1, %v2815_v18  ;;  %v2540_v56 = vpack.c.bf16 %v849_v54, %v848_v53  ;;  %v850_v59 = vld [vmem:[%s3125_s3 + $0x30] sm:$0xff]  ;;  %v2537_v60 = vpack.c.bf16 %v847_v58, %v846_v57  ;;  %v851_v61 = vld [vmem:[%s3125_s3 + $0x38] sm:$0xff]  ;;  %v852_v63 = vld [vmem:[%s3125_s3 + $0x40] sm:$0xff]  ;;  %p2622_p0 = scmp.lt.s32.totalorder %s3081_s19, %s2620_s10  ;;  %p2623_p1 = scmp.lt.s32.totalorder %s2621_s11, %s2615_s9 }
  0x1b   : > { %2499 = vmatpush3.bf16.msra.mxu0 %v2498_v19  ;;  %2505 = vmatpush3.bf16.msra.mxu1 %v2504_v20  ;;  %v2543_v62 = vpack.c.bf16 %v851_v61, %v850_v59  ;;  %v853_v0 = vld [vmem:[%s3125_s3 + $0x48] sm:$0xff]  ;;  %v856_v1 = vld [vmem:[%s3125_s3 + $0x60] sm:$0xff]  ;;  %v854_v6 = vld [vmem:[%s3125_s3 + $0x50] sm:$0xff] }
  0x1c   : > { %2500 = vmatprep.subr.bf16.mxu0 %v2679_v3  ;;  %2506 = vmatprep.subr.bf16.mxu1 %v2679_v3  ;;  %v2546_v2 = vpack.c.bf16 %v853_v0, %v852_v63  ;;  %v857_v4 = vld [vmem:[%s3125_s3 + $0x68] sm:$0xff]  ;;  %v855_v7 = vld [vmem:[%s3125_s3 + $0x58] sm:$0xff]  ;;  %v858_v8 = vld [vmem:[%s3125_s3 + $0x70] sm:$0xff]  ;;  %p2624_p2 = por %p2623_p1, %p2622_p0 }
  0x1d   : > { %2323 = vmatprep.mubr.msk.f32.mxu0 %vm2680_vm0, %v2681_v11  ;;  %2334 = vmatprep.mubr.msk.f32.mxu1 %vm2680_vm0, %v2681_v11  ;;  %v2552_v5 = vpack.c.bf16 %v857_v4, %v856_v1  ;;  %v2549_v9 = vpack.c.bf16 %v855_v7, %v854_v6  ;;  %v859_v10 = vld [vmem:[%s3125_s3 + $0x78] sm:$0xff] }
  0x1e   : > { %v2555_v12 = vpack.c.bf16 %v859_v10, %v858_v8  ;;  %p2625_p3 = pnand %p2624_p2, %p2618_p13 }
  0x1f   : > { %2502 = vmatpush3.bf16.msra.mxu0 %v2501_v25  ;;  %2508 = vmatpush3.bf16.msra.mxu1 %v2507_v26 }
  0x20   : > { %2509 = vmatprep.subr.bf16.mxu0 %v2679_v3  ;;  %2515 = vmatprep.subr.bf16.mxu1 %v2679_v3 }
  0x22   : > { %2324 = vmatmul.mubr.msk.f32.vlgmr.msra.gmra.mrb[2].mxu0 %vm264_vm1, %v2815_v18  ;;  %2335 = vmatmul.mubr.msk.f32.vlgmr.msra.gmra.mrb[2].mxu1 %vm264_vm1, %v2815_v18 }
  0x23   : > { %2511 = vmatpush3.bf16.msra.mxu0 %v2510_v31  ;;  %2517 = vmatpush3.bf16.msra.mxu1 %v2516_v32 }
  0x24   : > { %2512 = vmatprep.subr.bf16.mxu0 %v2679_v3  ;;  %2518 = vmatprep.subr.bf16.mxu1 %v2679_v3 }
  0x25   : > { %2345 = vmatprep.mubr.msk.f32.mxu0 %vm2680_vm0, %v2681_v11  ;;  %2356 = vmatprep.mubr.msk.f32.mxu1 %vm2680_vm0, %v2681_v11 }
  0x27   : > { %2514 = vmatpush3.bf16.msra.mxu0 %v2513_v37  ;;  %2520 = vmatpush3.bf16.msra.mxu1 %v2519_v38 }
  0x28   : > { %2521 = vmatprep.subr.bf16.mxu0 %v2679_v3  ;;  %2527 = vmatprep.subr.bf16.mxu1 %v2679_v3 }
  0x2a   : > { %2346 = vmatmul.mubr.msk.f32.vlgmr.msra.gmra.mrb[4].mxu0 %vm264_vm1, %v2815_v18  ;;  %2357 = vmatmul.mubr.msk.f32.vlgmr.msra.gmra.mrb[4].mxu1 %vm264_vm1, %v2815_v18 }
  0x2b   : > { %2523 = vmatpush3.bf16.msra.mxu0 %v2522_v43  ;;  %2529 = vmatpush3.bf16.msra.mxu1 %v2528_v44 }
  0x2c   : > { %2524 = vmatprep.subr.bf16.mxu0 %v2679_v3  ;;  %2530 = vmatprep.subr.bf16.mxu1 %v2679_v3 }
  0x2d   : > { %2367 = vmatprep.mubr.msk.f32.mxu0 %vm2680_vm0, %v2681_v11  ;;  %2378 = vmatprep.mubr.msk.f32.mxu1 %vm2680_vm0, %v2681_v11 }
  0x2f   : > { %2526 = vmatpush3.bf16.msra.mxu0 %v2525_v49  ;;  %2532 = vmatpush3.bf16.msra.mxu1 %v2531_v50 }
  0x30   : > { %2533 = vmatprep.subr.bf16.mxu0 %v2679_v3  ;;  %2539 = vmatprep.subr.bf16.mxu1 %v2679_v3 }
  0x32   : > { %2368 = vmatmul.mubr.msk.f32.vlgmr.msra.gmra.mrb[6].mxu0 %vm264_vm1, %v2815_v18  ;;  %2379 = vmatmul.mubr.msk.f32.vlgmr.msra.gmra.mrb[6].mxu1 %vm264_vm1, %v2815_v18 }
  0x33   : > { %2535 = vmatpush3.bf16.msra.mxu0 %v2534_v55  ;;  %2541 = vmatpush3.bf16.msra.mxu1 %v2540_v56 }
  0x34   : > { %2536 = vmatprep.subr.bf16.mxu0 %v2679_v3  ;;  %2542 = vmatprep.subr.bf16.mxu1 %v2679_v3 }
  0x35   : > { %2389 = vmatprep.mubr.msk.f32.mxu0 %vm2680_vm0, %v2681_v11  ;;  %2400 = vmatprep.mubr.msk.f32.mxu1 %vm2680_vm0, %v2681_v11 }
  0x37   : > { %2538 = vmatpush3.bf16.msra.mxu0 %v2537_v60  ;;  %2544 = vmatpush3.bf16.msra.mxu1 %v2543_v62 }
  0x38   : > { %2545 = vmatprep.subr.bf16.mxu0 %v2679_v3  ;;  %2551 = vmatprep.subr.bf16.mxu1 %v2679_v3 }
  0x3a   : > { %2390 = vmatmul.mubr.msk.f32.vlgmr.msra.gmra.mrb[8].mxu0 %vm264_vm1, %v2815_v18  ;;  %2401 = vmatmul.mubr.msk.f32.vlgmr.msra.gmra.mrb[8].mxu1 %vm264_vm1, %v2815_v18 }
  0x3b   : > { %2547 = vmatpush3.bf16.msra.mxu0 %v2546_v2  ;;  %2553 = vmatpush3.bf16.msra.mxu1 %v2552_v5 }
  0x3c   : > { %2548 = vmatprep.subr.bf16.mxu0 %v2679_v3  ;;  %2554 = vmatprep.subr.bf16.mxu1 %v2679_v3 }
  0x3d   : > { %2411 = vmatprep.mubr.msk.f32.mxu0 %vm2680_vm0, %v2681_v11  ;;  %2422 = vmatprep.mubr.msk.f32.mxu1 %vm2680_vm0, %v2681_v11 }
  0x3f   : > { %2550 = vmatpush3.bf16.msra.mxu0 %v2549_v9  ;;  %2556 = vmatpush3.bf16.msra.mxu1 %v2555_v12 }
  0x40   : > { %2425 = vmatprep.subr.mxu0 %v2681_v11  ;;  %2430 = vmatprep.subr.mxu1 %v2681_v11 }
  0x42   : > { %2412 = vmatmul.mubr.msk.f32.vlgmr.msra.gmra.mrb[10].mxu0 %vm264_vm1, %v2815_v18  ;;  %2423 = vmatmul.mubr.msk.f32.vlgmr.msra.gmra.mrb[10].mxu1 %vm264_vm1, %v2815_v18 }
  0x43   : > { %2427 = vmatprep.mubr.msk.f32.mxu0 %vm2680_vm0, %v2681_v11  ;;  %2432 = vmatprep.mubr.msk.f32.mxu1 %vm2680_vm0, %v2681_v11 }
  0xed   : > { %v334_v3 = vpop.f32.mrb[0].mxu0  ;;  %v404_v14 = vpop.f32.mrb[0].mxu1 }
  0xee   : > { %v2303_v13 = vpop.f32.mrb[1].mxu0  ;;  %v2314_v15 = vpop.f32.mrb[1].mxu1 }
  0xf5   : > { %v474_v16 = vpop.f32.mrb[2].mxu0  ;;  %v544_v19 = vpop.f32.mrb[2].mxu1 }
  0xf6   : > { %v2325_v17 = vpop.f32.mrb[3].mxu0  ;;  %v2336_v20 = vpop.f32.mrb[3].mxu1 }
  0xfd   : > { %v630_v21 = vpop.f32.mrb[4].mxu0  ;;  %v700_v22 = vpop.f32.mrb[4].mxu1 }
  0xfe   : > { %v2347_v23 = vpop.f32.mrb[5].mxu0  ;;  %2426 = vmatpush3.xpose.msk.msra.mxu0 %vm1140_vm2, %v630_v21  ;;  %2431 = vmatpush3.xpose.msk.msra.mxu1 %vm1140_vm2, %v700_v22  ;;  %v2358_v18 = vpop.f32.mrb[5].mxu1  ;;  %v1785_v22 = vld [vmem:[%s3126_s4] sm:$0xff] }
  0xff   : > { %2435 = vmatprep.subr.mxu0 %v2681_v11  ;;  %2440 = vmatprep.subr.mxu1 %v2681_v11  ;;  %v1786_v23 = vld [vmem:[%s3126_s4 + $0x8] sm:$0xff]  ;;  %v1787_v18 = vld [vmem:[%s3126_s4 + $0x10] sm:$0xff] }
 0x101   : > { %2428 = vmatmul.mubr.msk.f32.vlgmr.msra.gmra.mrb[12].mxu0 %vm1140_vm2, %v334_v3  ;;  %2433 = vmatmul.mubr.msk.f32.vlgmr.msra.gmra.mrb[12].mxu1 %vm1140_vm2, %v404_v14 }
 0x102   : > { %2437 = vmatprep.mubr.msk.f32.mxu0 %vm2680_vm0, %v2681_v11  ;;  %2442 = vmatprep.mubr.msk.f32.mxu1 %vm2680_vm0, %v2681_v11 }
 0x105   : > { %v770_v24 = vpop.f32.mrb[6].mxu0  ;;  %v840_v25 = vpop.f32.mrb[6].mxu1 }
 0x106   : > { %v2369_v26 = vpop.f32.mrb[7].mxu0  ;;  %2436 = vmatpush3.xpose.msk.msra.mxu0 %vm1140_vm2, %v770_v24  ;;  %2441 = vmatpush3.xpose.msk.msra.mxu1 %vm1140_vm2, %v840_v25  ;;  %v2380_v27 = vpop.f32.mrb[7].mxu1 }
 0x107   : > { %2445 = vmatprep.subr.mxu0 %v2681_v11  ;;  %2450 = vmatprep.subr.mxu1 %v2681_v11  ;;  %v1788_v26 = vld [vmem:[%s3126_s4 + $0x18] sm:$0xff] }
 0x109   : > { %2438 = vmatmul.mubr.msk.f32.vlgmr.msra.gmra.mrb[14].mxu0 %vm1140_vm2, %v474_v16  ;;  %2443 = vmatmul.mubr.msk.f32.vlgmr.msra.gmra.mrb[14].mxu1 %vm1140_vm2, %v544_v19 }
 0x10a   : > { %2447 = vmatprep.mubr.msk.f32.mxu0 %vm2680_vm0, %v2681_v11  ;;  %2452 = vmatprep.mubr.msk.f32.mxu1 %vm2680_vm0, %v2681_v11 }
 0x10d   : > { %v926_v28 = vpop.f32.mrb[8].mxu0  ;;  %v996_v30 = vpop.f32.mrb[8].mxu1 }
 0x10e   : > { %v2391_v29 = vpop.f32.mrb[9].mxu0  ;;  %2446 = vmatpush3.msra.mxu0 %v926_v28  ;;  %v2402_v31 = vpop.f32.mrb[9].mxu1  ;;  %2451 = vmatpush3.msra.mxu1 %v996_v30 }
 0x10f   : > { %2455 = vmatprep.subr.mxu0 %v2681_v11  ;;  %2460 = vmatprep.subr.mxu1 %v2681_v11 }
 0x115   : > { %v3017_v32 = vpop.f32.mrb[10].mxu0  ;;  %v3019_v33 = vpop.f32.mrb[10].mxu1 }
 0x116   : > { %v2413_v34 = vpop.f32.mrb[11].mxu0  ;;  %v2424_v35 = vpop.f32.mrb[11].mxu1 }
 0x1d4   : > { %v1213_v36 = vpop.f32.mrb[12].mxu0  ;;  %v1289_v38 = vpop.f32.mrb[12].mxu1 }
 0x1d5   : > { %v1445_v37 = vmul.f32 0.35355338, %v1213_v36  ;;  %v2429_v39 = vpop.f32.mrb[13].mxu0  ;;  %v2434_v40 = vpop.f32.mrb[13].mxu1  ;;  %v1446_v41 = vmul.f32 0.35355338, %v1289_v38 }
 0x1d7   : > { %v1449_v42 = vsel %vm1140_vm2, %v1445_v37, -inf  ;;  %v1452_v43 = vsel %vm1140_vm2, %v1446_v41, -inf }
 0x1d8   : > { %1450 = vmax.xlane.f32.xlu0 %v1449_v42 }
 0x1dc   : > { %1453 = vmax.xlane.f32.xlu0 %v1452_v43  ;;  %v1365_v44 = vpop.f32.mrb[14].mxu0  ;;  %v1441_v45 = vpop.f32.mrb[14].mxu1 }
 0x1dd   : > { %v1447_v46 = vmul.f32 0.35355338, %v1365_v44  ;;  %v2439_v47 = vpop.f32.mrb[15].mxu0  ;;  %v2444_v48 = vpop.f32.mrb[15].mxu1  ;;  %v1448_v49 = vmul.f32 0.35355338, %v1441_v45 }
 0x1de   : > { %v2204_v45 = vld [vmem:[%s3127_s5] ss:$0 sm:$0xff] }
 0x1df   : > { %v1455_v50 = vsel %vm1140_vm2, %v1447_v46, -inf  ;;  %v1458_v51 = vsel %vm1140_vm2, %v1448_v49, -inf }
 0x1e0   : > { %1456 = vmax.xlane.f32.xlu1 %v1455_v50 }
 0x1e4   : > { %1459 = vmax.xlane.f32.xlu1 %v1458_v51 }
 0x265   : > { %v1451_v52 = vpop.xlane.xlu0 %1450 }
 0x266   : > { %v1461_v53 = vsub.f32 %v1445_v37, %v1451_v52 }
 0x268   : > { %v1465_v54 = vmul.f32 1.442695, %v1461_v53 }
 0x269   : > { %v1454_v55 = vpop.xlane.xlu0 %1453 }
 0x26a   : > { %2599 = vpow2.f32 %v1465_v54  ;;  %v1462_v56 = vsub.f32 %v1446_v41, %v1454_v55 }
 0x26c   : > { %v1467_v57 = vmul.f32 1.442695, %v1462_v56 }
 0x26d   : > { %v1457_v58 = vpop.xlane.xlu1 %1456 }
 0x26e   : > { %2601 = vpow2.f32 %v1467_v57  ;;  %v1463_v59 = vsub.f32 %v1447_v46, %v1457_v58 }
 0x270   : > { %v1469_v60 = vmul.f32 1.442695, %v1463_v59 }
 0x271   : > { %v1460_v61 = vpop.xlane.xlu1 %1459 }
 0x272   : > { %2603 = vpow2.f32 %v1469_v60  ;;  %v1464_v62 = vsub.f32 %v1448_v49, %v1460_v61 }
 0x274   : > { %v2600_v63 = vpop.eup %2599  ;;  %v1471_v0 = vmul.f32 1.442695, %v1464_v62 }
 0x275   : > { %v1473_v1 = vsel %vm1140_vm2, %v2600_v63, 0.0 }
 0x276   : > { %2605 = vpow2.f32 %v1471_v0  ;;  %1474 = vadd.xlane.f32.xlu0 %v1473_v1 }
 0x278   : > { %v2602_v2 = vpop.eup %2601 }
 0x279   : > { %v1476_v4 = vsel %vm1140_vm2, %v2602_v2, 0.0 }
 0x27a   : > { %1477 = vadd.xlane.f32.xlu1 %v1476_v4 }
 0x27c   : > { %v2604_v5 = vpop.eup %2603 }
 0x27d   : > { %v1479_v6 = vsel %vm1140_vm2, %v2604_v5, 0.0 }
 0x27e   : > { %1480 = vadd.xlane.f32.xlu0 %v1479_v6 }
 0x280   : > { %v2606_v7 = vpop.eup %2605 }
 0x281   : > { %v1482_v8 = vsel %vm1140_vm2, %v2606_v7, 0.0 }
 0x282   : > { %1483 = vadd.xlane.f32.xlu1 %v1482_v8 }
 0x303   : > { %v1475_v9 = vpop.xlane.xlu0 %1474 }
 0x304   : > { %2607 = vrcp.f32 %v1475_v9 }
 0x307   : > { %v1478_v10 = vpop.xlane.xlu1 %1477 }
 0x308   : > { %2609 = vrcp.f32 %v1478_v10 }
 0x30b   : > { %v1481_v12 = vpop.xlane.xlu0 %1480 }
 0x30c   : > { %2611 = vrcp.f32 %v1481_v12 }
 0x30e   : > { %v2608_v3 = vpop.eup %2607 }
 0x30f   : > { %v1489_v13 = vmul.f32 %v2608_v3, %v2600_v63  ;;  %v1484_v14 = vpop.xlane.xlu1 %1483 }
 0x310   : > { %2613 = vrcp.f32 %v1484_v14 }
 0x311   : > { %2448 = vmatmul.mubr.msk.f32.vlgmr.msra.gmra.mrb[16].mxu0 %vm1140_vm2, %v1489_v13 }
 0x312   : > { %v2610_v15 = vpop.eup %2609  ;;  %2456 = vmatpush3.msra.mxu0 %v3017_v32  ;;  %2457 = vmatprep.mubr.msk.f32.mxu0 %vm2680_vm0, %v2681_v11 }
 0x313   : > { %v1490_v16 = vmul.f32 %v2610_v15, %v2602_v2  ;;  %2465 = vmatprep.subr.mxu0 %v2681_v11 }
 0x315   : > { %2453 = vmatmul.mubr.msk.f32.vlgmr.msra.gmra.mrb[16].mxu1 %vm1140_vm2, %v1490_v16 }
 0x316   : > { %v2612_v17 = vpop.eup %2611  ;;  %2461 = vmatpush3.msra.mxu1 %v3019_v33  ;;  %2462 = vmatprep.mubr.msk.f32.mxu1 %vm2680_vm0, %v2681_v11 }
 0x317   : > { %v1491_v19 = vmul.f32 %v2612_v17, %v2604_v5  ;;  %2470 = vmatprep.subr.mxu1 %v2681_v11 }
 0x319   : > { %2458 = vmatmul.mubr.msk.f32.vlgmr.msra.gmra.mrb[18].mxu0 %vm1140_vm2, %v1491_v19 }
 0x31a   : > { %v2614_v20 = vpop.eup %2613  ;;  %2467 = vmatprep.mubr.msk.f32.mxu0 %vm2680_vm0, %v2681_v11  ;;  %2466 = vmatpush3.msra.mxu0 %v1785_v22 }
 0x31b   : > { %v1492_v21 = vmul.f32 %v2614_v20, %v2606_v7  ;;  %2475 = vmatprep.subr.mxu0 %v2681_v11 }
 0x31d   : > { %2463 = vmatmul.mubr.msk.f32.vlgmr.msra.gmra.mrb[18].mxu1 %vm1140_vm2, %v1492_v21 }
 0x31e   : > { %2472 = vmatprep.mubr.msk.f32.mxu1 %vm2680_vm0, %v2681_v11  ;;  %2471 = vmatpush3.msra.mxu1 %v1786_v23 }
 0x31f   : > { %2480 = vmatprep.subr.mxu1 %v2681_v11 }
 0x3e4   : > { %v1562_v24 = vpop.f32.mrb[16].mxu0 }
 0x3e5   : > { %v2449_v25 = vpop.f32.mrb[17].mxu0  ;;  %2468 = vmatmul.mubr.msk.f32.vlgmr.msra.gmra.mrb[20].mxu0 %vm1140_vm2, %v1562_v24 }
 0x3e6   : > { %2476 = vmatpush3.msra.mxu0 %v1787_v18  ;;  %2477 = vmatprep.mubr.msk.f32.mxu0 %vm2680_vm0, %v2681_v11 }
 0x3e8   : > { %v1635_v27 = vpop.f32.mrb[16].mxu1 }
 0x3e9   : > { %v2454_v28 = vpop.f32.mrb[17].mxu1  ;;  %2473 = vmatmul.mubr.msk.f32.vlgmr.msra.gmra.mrb[20].mxu1 %vm1140_vm2, %v1635_v27 }
 0x3ea   : > { %2481 = vmatpush3.msra.mxu1 %v1788_v26  ;;  %2482 = vmatprep.mubr.msk.f32.mxu1 %vm2680_vm0, %v2681_v11 }
 0x3ec   : > { %v1708_v29 = vpop.f32.mrb[18].mxu0 }
 0x3ed   : > { %v2459_v30 = vpop.f32.mrb[19].mxu0  ;;  %2478 = vmatmul.mubr.msk.f32.vlgmr.msra.gmra.mrb[22].mxu0 %vm1140_vm2, %v1708_v29 }
 0x3f0   : > { %v1781_v31 = vpop.f32.mrb[18].mxu1 }
 0x3f1   : > { %v2464_v32 = vpop.f32.mrb[19].mxu1  ;;  %2483 = vmatmul.mubr.msk.f32.vlgmr.msra.gmra.mrb[22].mxu1 %vm1140_vm2, %v1781_v31 }
 0x4b8   : > { %v1858_v33 = vpop.f32.mrb[20].mxu0 }
 0x4b9   : > { %v2469_v34 = vpop.f32.mrb[21].mxu0  ;;  %v2081_v36 = vsel %vm264_vm1, %v1858_v33, 0.0 }
 0x4bc   : > { %v1931_v35 = vpop.f32.mrb[20].mxu1 }
 0x4bd   : > { %v2082_v37 = vsel %vm264_vm1, %v1931_v35, 0.0  ;;  %v2474_v38 = vpop.f32.mrb[21].mxu1 }
 0x4be   : > { %v2083_v39 = vadd.f32 %v2082_v37, %v2081_v36 }
 0x4c0   : > { %v2004_v11 = vpop.f32.mrb[22].mxu0 }
 0x4c1   : > { %v2084_v40 = vsel %vm264_vm1, %v2004_v11, 0.0  ;;  %v2479_v41 = vpop.f32.mrb[23].mxu0 }
 0x4c2   : > { %v2085_v42 = vadd.f32 %v2084_v40, %v2083_v39 }
 0x4c4   : > { %v2077_v43 = vpop.f32.mrb[22].mxu1 }
 0x4c5   : > { %v2086_v44 = vsel %vm264_vm1, %v2077_v43, 0.0  ;;  %v2484_v46 = vpop.f32.mrb[23].mxu1 }
 0x4c6   : > { %v2087_v47 = vadd.f32 %v2086_v44, %v2085_v42 }
 0x4c8   : > { %v2095_v48 = vadd.f32 %v2204_v45, %v2087_v47 }
 0x4ca   : > { %2096 = vst.msk [vmem:[%s242_s18] sm:$0xff] %vm264_vm1, %v2095_v48 }
 0x4cb   : > { %2628 = shalt.err (!%p2625_p3)
}
 0x4cc   : > { %s2629_s12 = scalar_lea.hbm %s3079_s28, 128  ;;  %s2633_s15 = scalar_lea.hbm %s3128_s6, 256 }
 0x4cd   : > { %p2630_p4 = scmp.ne.s32.totalorder %s3079_s28, %s2629_s12  ;;  %p2634_p9 = scmp.lt.u32.totalorder %s3079_s28, %s3128_s6 }
 0x4ce   : > { %p2635_p10 = scmp.lt.u32.totalorder %s2633_s15, %s2629_s12  ;;  %p2637_p12 = scmp.lt.u32.totalorder %s2629_s12, %s3079_s28 }
 0x4cf   : > { %p2631_p7 = pnand %p2630_p4, %p2756_p5 }
 0x4d0   : > { %p2636_p11 = por %p2635_p10, %p2634_p9 }
 0x4d1   : > { %p2632_p8 = pneg %p2631_p7 }
 0x4d2   : > { %p2638_p13 = por %p2637_p12, %p2636_p11 }
 0x4d4   : > { %p2639_p0 = pnand %p2638_p13, %p2632_p8 }
 0x4d6   : > { %2642 = shalt.err (!%p2639_p0)
}
 0x4d7   : > { %2557 = dma.vmem_to_hbm [thread:$0]  (%p2756_p5), %s3081_s19, 128, %s3079_s28, %s2098_s29  }
 0x4d8 PF: > { %p2563_p1 = scmp.ge.s32.totalorder %s2677_s24, 2  ;;  %s2123_s18 = sand.u32 1, %s2665_s21  }
 0x4d9   : > { %s2124_s20 = scalar_lea.sflag [#allocation3], %s2123_s18 }
 0x4da   : > { %p2560_p2 = pnand %p2563_p1, %p2760_p6 }
 0x4dc   : > { %2660 = dma.done.wait (!%p2560_p2), %s2124_s20, 128  }
 0x4dd   : > { %2662 = vsyncadd (!%p2560_p2), %s2124_s20, 4294967168  ;;  %p16_p3 = scmp.ge.s32.totalorder %s2743_s27, 4   ;;  %s3131_s21 = smov %s2669_s22 }
 0x4de   : > { %s3132_s22 = smov %s2673_s23  ;;  %s3133_s23 = smov %s2754_s30 }
 0x4df   : > { %s3134_s24 = smov %s2743_s27  ;;  %18 = sbr.rel (!%p16_p3) target bundleno = 3 (0x3), region = 79 }
 0x4e6   :  { %2129 = vsyncpa [#allocation3], 1 }
 0x4e7   :  { %2131 = vsyncpa [#allocation3 + $0x1], 1 }

</bundles_post_ra>
